<compile_context>
chip_gen: v7x
topology: tpu7x:2x2x1
jax: 0.10.0
libtpu: 0.0.40
codegen_flags: <defaults>
</compile_context>

<pallas_src>
import jax
import jax.numpy as jnp
from jax.experimental import pallas as pl
from jax.experimental.pallas import tpu as pltpu

LATENT = 12
HIDDEN = 64
OUT = 12
SLOPE = 0.2


def _flow_kernel(x_ref, w1_ref, w2_ref, w3_ref, w4l_ref, wbd_ref, out_ref):
    # x block streamed in bf16; all compute in f32.
    x = x_ref[...].astype(jnp.float32)            # (TB, LATENT)
    w1 = w1_ref[...]                              # (HIDDEN, LATENT)  f32, resident
    w2 = w2_ref[...]                              # (HIDDEN, HIDDEN)
    w3 = w3_ref[...]                              # (HIDDEN, HIDDEN)
    w4_last = w4l_ref[...]                        # (1, HIDDEN)   last row of W4
    wbd = wbd_ref[...]                            # (2*OUT, 2*HIDDEN) block-diag [W4 | W1^T]

    # a @ W.T with W in PyTorch (out, in) orientation — contract last dims.
    def lin(a, w):
        return jax.lax.dot_general(
            a, w, (((1,), (1,)), ((), ())), preferred_element_type=jnp.float32)

    # ---- forward pass (MXU matmuls + VPU leaky-relu) ----
    h1 = lin(x, w1)
    d1 = jnp.where(h1 > 0, 1.0, SLOPE)
    a1 = h1 * d1                                   # leaky_relu(h1)

    h2 = lin(a1, w2)
    d2 = jnp.where(h2 > 0, 1.0, SLOPE)
    a2 = h2 * d2

    h3 = lin(a2, w3)
    d3 = jnp.where(h3 > 0, 1.0, SLOPE)
    a3 = h3 * d3

    # ---- last Jacobian row, propagated as a row vector per sample ----
    u3 = w4_last * d3                              # (TB, HIDDEN)
    u2 = jnp.dot(u3, w3, preferred_element_type=jnp.float32) * d2
    u1 = jnp.dot(u2, w2, preferred_element_type=jnp.float32) * d1

    # ---- fused epilogue: [residual | jrow] in one K=128 matmul ----
    #   residual = a3 @ W4^T  ,  jrow = u1 @ W1      (block-diag weight)
    lhs = jnp.concatenate([a3, u1], axis=-1)       # (TB, 2*HIDDEN)
    fused = lin(lhs, wbd)                          # (TB, 2*OUT)

    # columns [0, OUT): residual (pass through); [OUT, 2*OUT): log|jrow|
    col = jax.lax.broadcasted_iota(jnp.int32, fused.shape, 1)
    out = jnp.where(col < OUT, fused, jnp.log(jnp.abs(fused)))
    out_ref[...] = out.astype(out_ref.dtype)


def _round_up(n, m):
    return ((n + m - 1) // m) * m


def yuke_mlpflow_onlyx(x, w1, w2, w3, w4, *, block_b=1024):
    """Returns (residual (B, OUT), log_abs_det_jacobian (B, LATENT)).

    block_b: batch tile. Default 1024 keeps the working set well under the
    16 MiB scoped-VMEM default (v5e) and the 64 MiB physical VMEM (v7x).
    """
    B = x.shape[0]
    TB = _round_up(min(block_b, _round_up(B, 16)), 16)   # sublane-friendly (bf16 packs 16)
    Bp = _round_up(B, TB)

    # Stream x in bf16 (mem-bound input); pad batch to a tile multiple.
    x_p = x.astype(jnp.bfloat16)
    if Bp != B:
        x_p = jnp.pad(x_p, ((0, Bp - B), (0, 0)))

    w1f = w1.astype(jnp.float32)
    w2f = w2.astype(jnp.float32)
    w3f = w3.astype(jnp.float32)
    w4f = w4.astype(jnp.float32)

    # Hoist the last row of W4 (kernel would otherwise re-gather it per step).
    w4_last = w4f[-1:, :]                                  # (1, HIDDEN)

    # Block-diagonal epilogue weight, (out, in) orientation: (2*OUT, 2*HIDDEN).
    wbd = jnp.zeros((2 * OUT, 2 * HIDDEN), jnp.float32)
    wbd = wbd.at[:OUT, :HIDDEN].set(w4f)                   # residual = a3 @ W4^T
    wbd = wbd.at[OUT:, HIDDEN:].set(w1f.T)                 # jrow     = u1 @ W1

    full = lambda shape: pl.BlockSpec(shape, lambda i: (0, 0))  # grid-resident
    out = pl.pallas_call(
        _flow_kernel,
        out_shape=jax.ShapeDtypeStruct((Bp, 2 * OUT), jnp.float32),
        grid=(pl.cdiv(Bp, TB),),
        in_specs=[
            pl.BlockSpec((TB, LATENT), lambda i: (i, 0)),   # x: tiled over batch
            full((HIDDEN, LATENT)),                         # w1
            full((HIDDEN, HIDDEN)),                         # w2
            full((HIDDEN, HIDDEN)),                         # w3
            full((1, HIDDEN)),                              # w4[-1, :]
            full((2 * OUT, 2 * HIDDEN)),                    # block-diag [W4 | W1^T]
        ],
        out_specs=pl.BlockSpec((TB, 2 * OUT), lambda i: (i, 0)),
        compiler_params=pltpu.CompilerParams(
            dimension_semantics=("parallel",)),             # megacore on v7x
    )(x_p, w1f, w2f, w3f, w4_last, wbd)

    residual = out[:B, :OUT]
    logdet = out[:B, OUT:]
    return residual, logdet


# ------------------------- plain-JAX reference -------------------------
def _mlp_ref(x, w1, w2, w3, w4):
    def lrelu(h):
        return jnp.where(h > 0, h, SLOPE * h)
    a1 = lrelu(x @ w1.T)
    a2 = lrelu(a1 @ w2.T)
    a3 = lrelu(a2 @ w3.T)
    return a3 @ w4.T


def _ref_forward(x, w1, w2, w3, w4):
    residual = _mlp_ref(x, w1, w2, w3, w4)
    J = jax.vmap(jax.jacfwd(lambda v: _mlp_ref(v[None, :], w1, w2, w3, w4)[0]))(x)
    logabsdet = jnp.log(jnp.abs(J[:, -1]))        # last row of each Jacobian
    return residual, logabsdet


if __name__ == "__main__":
    key = jax.random.PRNGKey(0)
    kx, k1, k2, k3, k4 = jax.random.split(key, 5)

    B = 200                                   # not a tile multiple -> exercises padding
    x = jax.random.normal(kx, (B, LATENT), dtype=jnp.float32)

    # Deterministic synthetic weights (PyTorch Linear shape: (out, in)).
    def init_w(k, out_f, in_f):
        bound = 1.0 / (in_f ** 0.5)
        return jax.random.uniform(k, (out_f, in_f), jnp.float32, -bound, bound)

    w1 = init_w(k1, HIDDEN, LATENT)
    w2 = init_w(k2, HIDDEN, HIDDEN)
    w3 = init_w(k3, HIDDEN, HIDDEN)
    w4 = init_w(k4, OUT, HIDDEN)

    residual, logdet = yuke_mlpflow_onlyx(x, w1, w2, w3, w4, block_b=128)
    jax.block_until_ready((residual, logdet))
    assert residual.shape == (B, OUT) and logdet.shape == (B, LATENT)

    # Reference uses the same bf16-rounded x the kernel streams.
    x_q = x.astype(jnp.bfloat16).astype(jnp.float32)
    res_ref, logdet_ref = _ref_forward(x_q, w1, w2, w3, w4)
    assert jnp.allclose(residual, res_ref, atol=1e-3, rtol=1e-3)
    assert jnp.allclose(logdet, logdet_ref, atol=1e-2, rtol=1e-2)

    print("KERNEL_OK")
</pallas_src>

<mosaic_0001>
module attributes {stable_mosaic.version = 11 : i64} {
  func.func @_flow_kernel(%arg0: i32, %arg1: memref<128x12xbf16, #tpu.memory_space<vmem>>, %arg2: memref<64x12xf32, #tpu.memory_space<vmem>>, %arg3: memref<64x64xf32, #tpu.memory_space<vmem>>, %arg4: memref<64x64xf32, #tpu.memory_space<vmem>>, %arg5: memref<1x64xf32, #tpu.memory_space<vmem>>, %arg6: memref<24x128xf32, #tpu.memory_space<vmem>>, %arg7: memref<128x24xf32, #tpu.memory_space<vmem>>) attributes {dimension_semantics = [#tpu.dimension_semantics<parallel>], iteration_bounds = array<i64: 2>, scalar_prefetch = 0 : i64, scratch_operands = 0 : i64, tpu.core_type = #tpu.core_type<tc>, window_params = [{transform_indices = @transform_0, window_bounds = array<i64: 128, 12>}, {pipeline_mode = #tpu.pipeline_mode<synchronous>, transform_indices = @transform_1, window_bounds = array<i64: 64, 12>}, {pipeline_mode = #tpu.pipeline_mode<synchronous>, transform_indices = @transform_2, window_bounds = array<i64: 64, 64>}, {pipeline_mode = #tpu.pipeline_mode<synchronous>, transform_indices = @transform_3, window_bounds = array<i64: 64, 64>}, {pipeline_mode = #tpu.pipeline_mode<synchronous>, transform_indices = @transform_4, window_bounds = array<i64: 1, 64>}, {pipeline_mode = #tpu.pipeline_mode<synchronous>, transform_indices = @transform_5, window_bounds = array<i64: 24, 128>}, {transform_indices = @transform_6, window_bounds = array<i64: 128, 24>}]} {
    %c0 = arith.constant 0 : index
    %c0_0 = arith.constant 0 : index
    %0 = vector.load %arg1[%c0, %c0_0] : memref<128x12xbf16, #tpu.memory_space<vmem>>, vector<128x12xbf16>
    %1 = arith.extf %0 : vector<128x12xbf16> to vector<128x12xf32>
    %c0_1 = arith.constant 0 : index
    %c0_2 = arith.constant 0 : index
    %2 = vector.load %arg2[%c0_1, %c0_2] : memref<64x12xf32, #tpu.memory_space<vmem>>, vector<64x12xf32>
    %c0_3 = arith.constant 0 : index
    %c0_4 = arith.constant 0 : index
    %3 = vector.load %arg3[%c0_3, %c0_4] : memref<64x64xf32, #tpu.memory_space<vmem>>, vector<64x64xf32>
    %c0_5 = arith.constant 0 : index
    %c0_6 = arith.constant 0 : index
    %4 = vector.load %arg4[%c0_5, %c0_6] : memref<64x64xf32, #tpu.memory_space<vmem>>, vector<64x64xf32>
    %c0_7 = arith.constant 0 : index
    %c0_8 = arith.constant 0 : index
    %5 = vector.load %arg5[%c0_7, %c0_8] : memref<1x64xf32, #tpu.memory_space<vmem>>, vector<1x64xf32>
    %c0_9 = arith.constant 0 : index
    %c0_10 = arith.constant 0 : index
    %6 = vector.load %arg6[%c0_9, %c0_10] : memref<24x128xf32, #tpu.memory_space<vmem>>, vector<24x128xf32>
    %cst = arith.constant dense<0.000000e+00> : vector<128x64xf32>
    %7 = tpu.matmul %1, %2, %cst {dimension_numbers = #tpu.dot_dimension_numbers<[1], [1], [0], [0], [0, 0, 1, 0], [], []>} : vector<128x12xf32>, vector<64x12xf32>, vector<128x64xf32> -> vector<128x64xf32>
    %cst_11 = arith.constant 0.000000e+00 : f32
    %8 = vector.broadcast %cst_11 : f32 to vector<128x64xf32>
    %9 = arith.cmpf ogt, %7, %8 : vector<128x64xf32>
    %cst_12 = arith.constant 1.000000e+00 : f32
    %cst_13 = arith.constant 2.000000e-01 : f32
    %10 = vector.broadcast %cst_12 : f32 to vector<128x64xf32>
    %11 = vector.broadcast %cst_13 : f32 to vector<128x64xf32>
    %12 = arith.select %9, %10, %11 : vector<128x64xi1>, vector<128x64xf32>
    %13 = arith.mulf %7, %12 : vector<128x64xf32>
    %cst_14 = arith.constant dense<0.000000e+00> : vector<128x64xf32>
    %14 = tpu.matmul %13, %3, %cst_14 {dimension_numbers = #tpu.dot_dimension_numbers<[1], [1], [0], [0], [0, 0, 1, 0], [], []>} : vector<128x64xf32>, vector<64x64xf32>, vector<128x64xf32> -> vector<128x64xf32>
    %cst_15 = arith.constant 0.000000e+00 : f32
    %15 = vector.broadcast %cst_15 : f32 to vector<128x64xf32>
    %16 = arith.cmpf ogt, %14, %15 : vector<128x64xf32>
    %cst_16 = arith.constant 1.000000e+00 : f32
    %cst_17 = arith.constant 2.000000e-01 : f32
    %17 = vector.broadcast %cst_16 : f32 to vector<128x64xf32>
    %18 = vector.broadcast %cst_17 : f32 to vector<128x64xf32>
    %19 = arith.select %16, %17, %18 : vector<128x64xi1>, vector<128x64xf32>
    %20 = arith.mulf %14, %19 : vector<128x64xf32>
    %cst_18 = arith.constant dense<0.000000e+00> : vector<128x64xf32>
    %21 = tpu.matmul %20, %4, %cst_18 {dimension_numbers = #tpu.dot_dimension_numbers<[1], [1], [0], [0], [0, 0, 1, 0], [], []>} : vector<128x64xf32>, vector<64x64xf32>, vector<128x64xf32> -> vector<128x64xf32>
    %cst_19 = arith.constant 0.000000e+00 : f32
    %22 = vector.broadcast %cst_19 : f32 to vector<128x64xf32>
    %23 = arith.cmpf ogt, %21, %22 : vector<128x64xf32>
    %cst_20 = arith.constant 1.000000e+00 : f32
    %cst_21 = arith.constant 2.000000e-01 : f32
    %24 = vector.broadcast %cst_20 : f32 to vector<128x64xf32>
    %25 = vector.broadcast %cst_21 : f32 to vector<128x64xf32>
    %26 = arith.select %23, %24, %25 : vector<128x64xi1>, vector<128x64xf32>
    %27 = arith.mulf %21, %26 : vector<128x64xf32>
    %28 = vector.broadcast %5 : vector<1x64xf32> to vector<128x64xf32>
    %29 = arith.mulf %28, %26 : vector<128x64xf32>
    %cst_22 = arith.constant dense<0.000000e+00> : vector<128x64xf32>
    %30 = tpu.matmul %29, %4, %cst_22 {dimension_numbers = #tpu.dot_dimension_numbers<[1], [0], [0], [1], [0, 0, 1, 1], [], []>} : vector<128x64xf32>, vector<64x64xf32>, vector<128x64xf32> -> vector<128x64xf32>
    %31 = arith.mulf %30, %19 : vector<128x64xf32>
    %cst_23 = arith.constant dense<0.000000e+00> : vector<128x64xf32>
    %32 = tpu.matmul %31, %3, %cst_23 {dimension_numbers = #tpu.dot_dimension_numbers<[1], [0], [0], [1], [0, 0, 1, 1], [], []>} : vector<128x64xf32>, vector<64x64xf32>, vector<128x64xf32> -> vector<128x64xf32>
    %33 = arith.mulf %32, %12 : vector<128x64xf32>
    %34 = tpu.concatenate %27, %33 in 1 : vector<128x64xf32>, vector<128x64xf32> -> vector<128x128xf32>
    %cst_24 = arith.constant dense<0.000000e+00> : vector<128x24xf32>
    %35 = tpu.matmul %34, %6, %cst_24 {dimension_numbers = #tpu.dot_dimension_numbers<[1], [1], [0], [0], [0, 0, 1, 0], [], []>} : vector<128x128xf32>, vector<24x128xf32>, vector<128x24xf32> -> vector<128x24xf32>
    %36 = tpu.iota {dimensions = array<i32: 1>} : vector<128x24xi32>
    %c12_i32 = arith.constant 12 : i32
    %37 = vector.broadcast %c12_i32 : i32 to vector<128x24xi32>
    %38 = arith.cmpi slt, %36, %37 : vector<128x24xi32>
    %39 = math.absf %35 : vector<128x24xf32>
    %40 = math.log %39 : vector<128x24xf32>
    %41 = arith.select %38, %35, %40 : vector<128x24xi1>, vector<128x24xf32>
    %c0_25 = arith.constant 0 : index
    %c0_26 = arith.constant 0 : index
    %42 = vector.load %arg7[%c0_25, %c0_26] : memref<128x24xf32, #tpu.memory_space<vmem>>, vector<128x24xf32>
    tpu.vector_store %arg7[%c0_25, %c0_26], %41 {strides = array<i32>} : memref<128x24xf32, #tpu.memory_space<vmem>>, vector<128x24xf32>,
    return
  }
  func.func @transform_0(%arg0: i32) -> (i32, i32) {
    %c0_i32 = arith.constant 0 : i32
    %c0_i32_0 = arith.constant 0 : i32
    return %arg0, %c0_i32 : i32, i32
  }
  func.func @transform_1(%arg0: i32) -> (i32, i32) {
    %c0_i32 = arith.constant 0 : i32
    %c0_i32_0 = arith.constant 0 : i32
    %c0_i32_1 = arith.constant 0 : i32
    return %c0_i32, %c0_i32_0 : i32, i32
  }
  func.func @transform_2(%arg0: i32) -> (i32, i32) {
    %c0_i32 = arith.constant 0 : i32
    %c0_i32_0 = arith.constant 0 : i32
    %c0_i32_1 = arith.constant 0 : i32
    return %c0_i32, %c0_i32_0 : i32, i32
  }
  func.func @transform_3(%arg0: i32) -> (i32, i32) {
    %c0_i32 = arith.constant 0 : i32
    %c0_i32_0 = arith.constant 0 : i32
    %c0_i32_1 = arith.constant 0 : i32
    return %c0_i32, %c0_i32_0 : i32, i32
  }
  func.func @transform_4(%arg0: i32) -> (i32, i32) {
    %c0_i32 = arith.constant 0 : i32
    %c0_i32_0 = arith.constant 0 : i32
    %c0_i32_1 = arith.constant 0 : i32
    return %c0_i32, %c0_i32_0 : i32, i32
  }
  func.func @transform_5(%arg0: i32) -> (i32, i32) {
    %c0_i32 = arith.constant 0 : i32
    %c0_i32_0 = arith.constant 0 : i32
    %c0_i32_1 = arith.constant 0 : i32
    return %c0_i32, %c0_i32_0 : i32, i32
  }
  func.func @transform_6(%arg0: i32) -> (i32, i32) {
    %c0_i32 = arith.constant 0 : i32
    %c0_i32_0 = arith.constant 0 : i32
    return %arg0, %c0_i32 : i32, i32
  }
}

</mosaic_0001>

<bundles_post_ra>
// kernel: tpu_custom_call.1
= control target key start
LH: loop header
LB: loop body
LE: loop exit
PB: predicated region body
PF: predicated region fallthrough
CT: control target
= control target key end

     0   :  { %s2676_s21 = smov 0   ;;  %s3290_s0 = inlined_call_operand.vmem [shape: bf16[256,12], index: 0, kind: input, shape index: {}]   ;;  %s3291_s1 = inlined_call_operand.vmem [shape: f32[64,12], index: 1, kind: input, shape index: {}]   ;;  %s3292_s2 = inlined_call_operand.vmem [shape: f32[64,64], index: 2, kind: input, shape index: {}]   ;;  %s3293_s3 = inlined_call_operand.vmem [shape: f32[64,64], index: 3, kind: input, shape index: {}]   ;;  %s3294_s4 = inlined_call_operand.vmem [shape: f32[1,64], index: 4, kind: input, shape index: {}]   ;;  %s3295_s5 = inlined_call_operand.vmem [shape: f32[24,128], index: 5, kind: input, shape index: {}]   ;;  %s3296_s6 = inlined_call_operand.vmem [shape: f32[256,24], index: 6, kind: output, shape index: {}]  }
   0x1 LB: > { %s1917_s22 = sadd.s32 4294967295, %s2637_s21   ;;  %p1921_p0 = scmp.ge.s32.totalorder %s2637_s21, 1  ;;  %s2637_s21 = sphi %s2676_s21, %s16_s21  }
   0x2   : > { %p213_p1 = scmp.lt.s32.totalorder %s2637_s21, 3 }
   0x4   : > { %p214_p2 = pnand %p1921_p0, %p213_p1 }
   0x5   : > { %v287_v0 = vld [vmem:[%s3291_s1] sm:$0xff] (!%p214_p2)  ;;  %v288_v1 = vld [vmem:[%s3291_s1 + $0x8] sm:$0xff] (!%p214_p2)  ;;  %vm315_vm0 = vcmask (!%p214_p2), 97280   ;;  %v289_v2 = vld [vmem:[%s3291_s1 + $0x10] sm:$0xff] (!%p214_p2)  ;;  %s1922_s29 = sshll.u32 (!%p214_p2), %s1917_s22, 4  ;;  %vm581_vm1 = vcmask (!%p214_p2), 523264  }
   0x6   : > { %217 = sbr.rel (%p214_p2) target bundleno = 1504 (0x5e0), region = 44  ;;  %v2441_v3 = vpack.c.bf16 (!%p214_p2), %v288_v1, %v287_v0  ;;  %vm2695_vm2 = vmpackc.low (!%p214_p2), %vm315_vm0, %vm315_vm0  ;;  %v290_v5 = vld [vmem:[%s3291_s1 + $0x18] sm:$0xff] (!%p214_p2)  ;;  %p244_p3 = scmp.lt.s32.totalorder (!%p214_p2), %s1922_s29, 31  ;;  %v295_v7 = vld [vmem:[%s3292_s2] sm:$0xff] (!%p214_p2)  ;;  %v2639_v0 = vmov (!%p214_p2), 0.2  }
   0x7   : > { %v2447_v6 = vpack.c.bf16 (!%p214_p2), %v290_v5, %v289_v2  ;;  %v296_v8 = vld [vmem:[%s3292_s2 + $0x8] sm:$0xff] (!%p214_p2)  ;;  %vm2714_vm3 = vmpackc.low (!%p214_p2), %vm581_vm1, %vm581_vm1  ;;  %v297_v11 = vld [vmem:[%s3292_s2 + $0x10] sm:$0xff] (!%p214_p2) }
   0x8   : > { %2443 = vmatprep.subr.msk.bf16.mxu0 (!%p214_p2), %vm2695_vm2, %v2441_v3  ;;  %v2720_v10 = vpack.c.bf16 (!%p214_p2), %v296_v8, %v295_v7  ;;  %v298_v12 = vld [vmem:[%s3292_s2 + $0x18] sm:$0xff] (!%p214_p2)  ;;  %v291_v14 = vld [vmem:[%s3291_s1 + $0x20] sm:$0xff] (!%p214_p2)  ;;  %v292_v15 = vld [vmem:[%s3291_s1 + $0x28] sm:$0xff] (!%p214_p2) }
   0x9   : > { %2446 = vmatpush3.bf16.xpose.msk.msra.mxu0 (!%p214_p2), %vm2695_vm2, %v2441_v3  ;;  %v2731_v13 = vpack.c.bf16 (!%p214_p2), %v298_v12, %v297_v11  ;;  %v2453_v18 = vpack.c.bf16 (!%p214_p2), %v292_v15, %v291_v14  ;;  %v299_v19 = vld [vmem:[%s3292_s2 + $0x20] sm:$0xff] (!%p214_p2)  ;;  %v300_v20 = vld [vmem:[%s3292_s2 + $0x28] sm:$0xff] (!%p214_p2)  ;;  %v293_v22 = vld [vmem:[%s3291_s1 + $0x30] sm:$0xff] (!%p214_p2) }
   0xa   : > { %2449 = vmatprep.subr.msk.bf16.mxu0 (!%p214_p2), %vm2695_vm2, %v2447_v6  ;;  %2467 = vmatprep.subr.msk.bf16.mxu1 (!%p214_p2), %vm2714_vm3, %v2720_v10  ;;  %v2763_v21 = vpack.c.bf16 (!%p214_p2), %v300_v20, %v299_v19  ;;  %v294_v23 = vld [vmem:[%s3291_s1 + $0x38] sm:$0xff] (!%p214_p2)  ;;  %v301_v25 = vld [vmem:[%s3292_s2 + $0x30] sm:$0xff] (!%p214_p2)  ;;  %v303_v50 = vld [vmem:[%s3293_s3] sm:$0xff] (!%p214_p2) }
   0xb   : > { %2470 = vmatpush3.bf16.xpose.msk.msra.mxu1 (!%p214_p2), %vm2714_vm3, %v2720_v10  ;;  %v2459_v24 = vpack.c.bf16 (!%p214_p2), %v294_v23, %v293_v22  ;;  %v302_v26 = vld [vmem:[%s3292_s2 + $0x38] sm:$0xff] (!%p214_p2)  ;;  %v304_v51 = vld [vmem:[%s3293_s3 + $0x8] sm:$0xff] (!%p214_p2)  ;;  %v305_v52 = vld [vmem:[%s3293_s3 + $0x10] sm:$0xff] (!%p214_p2) }
   0xc   : > { %2473 = vmatprep.subr.msk.bf16.mxu1 (!%p214_p2), %vm2714_vm3, %v2731_v13  ;;  %v2787_v27 = vpack.c.bf16 (!%p214_p2), %v302_v26, %v301_v25  ;;  %v2489_v53 = vpack.c.bf16 (!%p214_p2), %v304_v51, %v303_v50  ;;  %v306_v54 = vld [vmem:[%s3293_s3 + $0x18] sm:$0xff] (!%p214_p2)  ;;  %v307_v56 = vld [vmem:[%s3293_s3 + $0x20] sm:$0xff] (!%p214_p2)  ;;  %v308_v57 = vld [vmem:[%s3293_s3 + $0x28] sm:$0xff] (!%p214_p2) }
   0xd   : > { %s3302_s29 = smov (!%p244_p3, %s1922_s29), 31  ;;  %v2495_v55 = vpack.c.bf16 %v306_v54, %v305_v52  ;;  %v2501_v58 = vpack.c.bf16 %v308_v57, %v307_v56  ;;  %v309_v59 = vld [vmem:[%s3293_s3 + $0x30] sm:$0xff]  ;;  %v310_v60 = vld [vmem:[%s3293_s3 + $0x38] sm:$0xff] }
   0xe   : > { %s1923_s16 = sshll.u32 %s3302_s29, 2  ;;  %v2507_v61 = vpack.c.bf16 %v310_v60, %v309_v59  ;;  %s1925_s17 = sshll.u32 %s3302_s29, 3 }
   0xf   : > { %s2742_s24 = scalar_lea.vmem %s3290_s0, %s1923_s16  ;;  %s2640_s16 = smov 64  }
  0x10   : > { %v2034_v16 = vld [vmem:[%s2742_s24] sm:$0xff]   ;;  %v2065_v28 = vld [vmem:[%s2742_s24 + $0x8] sm:$0xff]   ;;  %v2066_v31 = vld [vmem:[%s2742_s24 + $0x10] sm:$0xff]   ;;  %s3221_s20 = scalar_lea.vmem %s3296_s6, %s1925_s17 }
  0x11   : > { %v2035_v17 = vunpack.c.l.bf16 %v2034_v16  ;;  %2452 = vmatpush3.bf16.xpose.msk.msra.mxu0 %vm2695_vm2, %v2447_v6  ;;  %v2036_v29 = vunpack.c.h.bf16 %v2034_v16  ;;  %v2039_v30 = vunpack.c.l.bf16 %v2065_v28  ;;  %v2040_v32 = vunpack.c.h.bf16 %v2065_v28  ;;  %v2067_v34 = vld [vmem:[%s2742_s24 + $0x18] sm:$0xff]   ;;  %v2068_v37 = vld [vmem:[%s2742_s24 + $0x20] sm:$0xff]   ;;  %v2069_v40 = vld [vmem:[%s2742_s24 + $0x28] sm:$0xff]  }
  0x12   : > { %2455 = vmatprep.subr.msk.bf16.mxu0 %vm2695_vm2, %v2453_v18  ;;  %v2043_v33 = vunpack.c.l.bf16 %v2066_v31  ;;  %v2044_v35 = vunpack.c.h.bf16 %v2066_v31  ;;  %v2047_v36 = vunpack.c.l.bf16 %v2067_v34  ;;  %v2048_v38 = vunpack.c.h.bf16 %v2067_v34  ;;  %v2070_v43 = vld [vmem:[%s2742_s24 + $0x30] sm:$0xff]   ;;  %v2071_v46 = vld [vmem:[%s2742_s24 + $0x38] sm:$0xff]  }
  0x13   : > { %2227 = vmatprep.mubr.msk.f32.mxu0 %vm315_vm0, %v2035_v17  ;;  %2476 = vmatpush3.bf16.xpose.msk.msra.mxu1 %vm2714_vm3, %v2731_v13  ;;  %v2051_v39 = vunpack.c.l.bf16 %v2068_v37  ;;  %v2052_v41 = vunpack.c.h.bf16 %v2068_v37  ;;  %v2055_v42 = vunpack.c.l.bf16 %v2069_v40  ;;  %v2056_v44 = vunpack.c.h.bf16 %v2069_v40 }
  0x14   : > { %2479 = vmatprep.subr.msk.bf16.mxu1 %vm2714_vm3, %v2763_v21  ;;  %v2059_v45 = vunpack.c.l.bf16 %v2070_v43  ;;  %v2060_v47 = vunpack.c.h.bf16 %v2070_v43  ;;  %v2063_v48 = vunpack.c.l.bf16 %v2071_v46  ;;  %v2064_v49 = vunpack.c.h.bf16 %v2071_v46 }
  0x19   : > { %2458 = vmatpush3.bf16.xpose.msk.msra.mxu0 %vm2695_vm2, %v2453_v18 }
  0x1a   : > { %2461 = vmatprep.subr.msk.bf16.mxu0 %vm2695_vm2, %v2459_v24 }
  0x1b   : > { %2482 = vmatpush3.bf16.xpose.msk.msra.mxu1 %vm2714_vm3, %v2763_v21 }
  0x1c   : > { %2485 = vmatprep.subr.msk.bf16.mxu1 %vm2714_vm3, %v2787_v27 }
  0x21   : > { %2464 = vmatpush3.bf16.xpose.msk.msra.mxu0 %vm2695_vm2, %v2459_v24 }
  0x22   : > { %2491 = vmatprep.subr.msk.bf16.mxu0 %vm2714_vm3, %v2489_v53 }
  0x23   : > { %2488 = vmatpush3.bf16.xpose.msk.msra.mxu1 %vm2714_vm3, %v2787_v27 }
  0x24   : > { %2514 = vmatprep.subr.bf16.mxu1 %v2489_v53 }
  0x28   : > { %2228 = vmatmul.mubr.msk.f32.vlgmr.msra.gmra.mrb[0].mxu0 %vm315_vm0, %v2036_v29 }
  0x29   : > { %2230 = vmatprep.mubr.msk.f32.mxu0 %vm315_vm0, %v2039_v30  ;;  %2494 = vmatpush3.bf16.xpose.msk.msra.mxu0 %vm2714_vm3, %v2489_v53 }
  0x2a   : > { %2497 = vmatprep.subr.msk.bf16.mxu0 %vm2714_vm3, %v2495_v55 }
  0x2c   : > { %2231 = vmatmul.mubr.msk.f32.gmra.mrb[2].mxu0 %vm315_vm0, %v2040_v32 }
  0x2d   : > { %2233 = vmatprep.mubr.msk.f32.mxu0 %vm315_vm0, %v2043_v33 }
  0x30   : > { %2234 = vmatmul.mubr.msk.f32.gmra.mrb[4].mxu0 %vm315_vm0, %v2044_v35 }
  0x31   : > { %2236 = vmatprep.mubr.msk.f32.mxu0 %vm315_vm0, %v2047_v36  ;;  %2500 = vmatpush3.bf16.xpose.msk.msra.mxu0 %vm2714_vm3, %v2495_v55 }
  0x32   : > { %2503 = vmatprep.subr.msk.bf16.mxu0 %vm2714_vm3, %v2501_v58 }
  0x34   : > { %2237 = vmatmul.mubr.msk.f32.gmra.mrb[6].mxu0 %vm315_vm0, %v2048_v38 }
  0x35   : > { %2239 = vmatprep.mubr.msk.f32.mxu0 %vm315_vm0, %v2051_v39 }
  0x38   : > { %2240 = vmatmul.mubr.msk.f32.gmra.mrb[8].mxu0 %vm315_vm0, %v2052_v41 }
  0x39   : > { %2242 = vmatprep.mubr.msk.f32.mxu0 %vm315_vm0, %v2055_v42  ;;  %2506 = vmatpush3.bf16.xpose.msk.msra.mxu0 %vm2714_vm3, %v2501_v58 }
  0x3a   : > { %2509 = vmatprep.subr.msk.bf16.mxu0 %vm2714_vm3, %v2507_v61 }
  0x3c   : > { %2243 = vmatmul.mubr.msk.f32.gmra.mrb[10].mxu0 %vm315_vm0, %v2056_v44 }
  0x3d   : > { %2245 = vmatprep.mubr.msk.f32.mxu0 %vm315_vm0, %v2059_v45 }
  0x40   : > { %2246 = vmatmul.mubr.msk.f32.gmra.mrb[12].mxu0 %vm315_vm0, %v2060_v47 }
  0x41   : > { %2248 = vmatprep.mubr.msk.f32.mxu0 %vm315_vm0, %v2063_v48  ;;  %2512 = vmatpush3.bf16.xpose.msk.msra.mxu0 %vm2714_vm3, %v2507_v61 }
  0x42   : > { %2530 = vmatprep.subr.bf16.mxu0 %v2720_v10 }
  0x44   : > { %2249 = vmatmul.mubr.msk.f32.gmra.mrb[14].mxu0 %vm315_vm0, %v2064_v49 }
  0xfb   : > { %v2229_v62 = vpop.f32.mrb[0].mxu0 }
  0xfc   : > { %vm534_vm4 = vcmp.gt.f32.partialorder %v2229_v62, 0.0  ;;  %v454_v63 = vpop.f32.mrb[1].mxu0 }
  0xfd   : > { %v2866_v1 = vsel %vm534_vm4, 1.0, %v2639_v0  ;;  %vm533_vm5 = vcmp.gt.f32.partialorder %v454_v63, 0.0 }
  0xfe   : > { %v2869_v2 = vsel %vm533_vm5, 1.0, %v2639_v0  ;;  %v566_v5 = vmul.f32 %v2229_v62, %v2866_v1 }
  0xff   : > { %v2232_v3 = vpop.f32.mrb[2].mxu0  ;;  %v565_v4 = vmul.f32 %v2869_v2, %v454_v63 }
 0x100   : > { %vm536_vm6 = vcmp.gt.f32.partialorder %v2232_v3, 0.0  ;;  %v464_v6 = vpop.f32.mrb[3].mxu0 }
 0x101   : > { %v2874_v7 = vsel %vm536_vm6, 1.0, %v2639_v0  ;;  %vm535_vm7 = vcmp.gt.f32.partialorder %v464_v6, 0.0  ;;  %2267 = vmatprep.mubr.msk.f32.mxu1 %vm581_vm1, %v565_v4 }
 0x102   : > { %v2878_v8 = vsel %vm535_vm7, 1.0, %v2639_v0  ;;  %2268 = vmatmul.mubr.msk.f32.vlgmr.msra.gmra.mrb[0].mxu1 %vm581_vm1, %v566_v5  ;;  %v568_v12 = vmul.f32 %v2232_v3, %v2874_v7 }
 0x103   : > { %v567_v9 = vmul.f32 %v2878_v8, %v464_v6  ;;  %v2235_v11 = vpop.f32.mrb[4].mxu0  ;;  %2516 = vmatpush3.bf16.msra.mxu1 %v2489_v53 }
 0x104   : > { %vm538_vm8 = vcmp.gt.f32.partialorder %v2235_v11, 0.0  ;;  %v474_v14 = vpop.f32.mrb[5].mxu0  ;;  %2518 = vmatprep.subr.bf16.mxu1 %v2495_v55 }
 0x105   : > { %v2884_v15 = vsel %vm538_vm8, 1.0, %v2639_v0  ;;  %vm537_vm9 = vcmp.gt.f32.partialorder %v474_v14, 0.0  ;;  %2270 = vmatprep.mubr.msk.f32.mxu1 %vm581_vm1, %v567_v9 }
 0x106   : > { %v2888_v16 = vsel %vm537_vm9, 1.0, %v2639_v0  ;;  %2271 = vmatmul.mubr.msk.f32.gmra.mrb[2].mxu1 %vm581_vm1, %v568_v12  ;;  %v570_v19 = vmul.f32 %v2235_v11, %v2884_v15 }
 0x107   : > { %v569_v17 = vmul.f32 %v2888_v16, %v474_v14  ;;  %v2238_v18 = vpop.f32.mrb[6].mxu0  ;;  %2520 = vmatpush3.bf16.msra.mxu1 %v2495_v55 }
 0x108   : > { %vm540_vm10 = vcmp.gt.f32.partialorder %v2238_v18, 0.0  ;;  %v484_v20 = vpop.f32.mrb[7].mxu0  ;;  %2522 = vmatprep.subr.bf16.mxu1 %v2501_v58 }
 0x109   : > { %v2894_v22 = vsel %vm540_vm10, 1.0, %v2639_v0  ;;  %vm539_vm11 = vcmp.gt.f32.partialorder %v484_v20, 0.0  ;;  %2273 = vmatprep.mubr.msk.f32.mxu1 %vm581_vm1, %v569_v17 }
 0x10a   : > { %v2898_v23 = vsel %vm539_vm11, 1.0, %v2639_v0  ;;  %2274 = vmatmul.mubr.msk.f32.gmra.mrb[4].mxu1 %vm581_vm1, %v570_v19  ;;  %v572_v26 = vmul.f32 %v2238_v18, %v2894_v22 }
 0x10b   : > { %v571_v24 = vmul.f32 %v2898_v23, %v484_v20  ;;  %v2241_v25 = vpop.f32.mrb[8].mxu0  ;;  %2524 = vmatpush3.bf16.msra.mxu1 %v2501_v58 }
 0x10c   : > { %vm542_vm12 = vcmp.gt.f32.partialorder %v2241_v25, 0.0  ;;  %v494_v28 = vpop.f32.mrb[9].mxu0  ;;  %2526 = vmatprep.subr.bf16.mxu1 %v2507_v61 }
 0x10d   : > { %v2904_v29 = vsel %vm542_vm12, 1.0, %v2639_v0  ;;  %vm541_vm13 = vcmp.gt.f32.partialorder %v494_v28, 0.0  ;;  %2276 = vmatprep.mubr.msk.f32.mxu1 %vm581_vm1, %v571_v24 }
 0x10e   : > { %v2908_v30 = vsel %vm541_vm13, 1.0, %v2639_v0  ;;  %2277 = vmatmul.mubr.msk.f32.gmra.mrb[6].mxu1 %vm581_vm1, %v572_v26  ;;  %v574_v33 = vmul.f32 %v2241_v25, %v2904_v29 }
 0x10f   : > { %v573_v31 = vmul.f32 %v2908_v30, %v494_v28  ;;  %v2244_v32 = vpop.f32.mrb[10].mxu0  ;;  %2528 = vmatpush3.bf16.msra.mxu1 %v2507_v61 }
 0x110   : > { %vm544_vm14 = vcmp.gt.f32.partialorder %v2244_v32, 0.0  ;;  %v504_v34 = vpop.f32.mrb[11].mxu0 }
 0x111   : > { %v2914_v35 = vsel %vm544_vm14, 1.0, %v2639_v0  ;;  %vm543_vm15 = vcmp.gt.f32.partialorder %v504_v34, 0.0  ;;  %2279 = vmatprep.mubr.msk.f32.mxu1 %vm581_vm1, %v573_v31 }
 0x112   : > { %v2918_v36 = vsel %vm543_vm15, 1.0, %v2639_v0  ;;  %2280 = vmatmul.mubr.msk.f32.gmra.mrb[8].mxu1 %vm581_vm1, %v574_v33  ;;  %v576_v39 = vmul.f32 %v2244_v32, %v2914_v35 }
 0x113   : > { %v575_v37 = vmul.f32 %v2918_v36, %v504_v34  ;;  %v2247_v38 = vpop.f32.mrb[12].mxu0 }
 0x114   : > { %vm546_vm0 = vcmp.gt.f32.partialorder %v2247_v38, 0.0  ;;  %v514_v40 = vpop.f32.mrb[13].mxu0 }
 0x115   : > { %v2924_v41 = vsel %vm546_vm0, 1.0, %v2639_v0  ;;  %vm545_vm2 = vcmp.gt.f32.partialorder %v514_v40, 0.0  ;;  %2282 = vmatprep.mubr.msk.f32.mxu1 %vm581_vm1, %v575_v37 }
 0x116   : > { %v2928_v42 = vsel %vm545_vm2, 1.0, %v2639_v0  ;;  %2283 = vmatmul.mubr.msk.f32.gmra.mrb[10].mxu1 %vm581_vm1, %v576_v39  ;;  %v578_v45 = vmul.f32 %v2247_v38, %v2924_v41 }
 0x117   : > { %v577_v43 = vmul.f32 %v2928_v42, %v514_v40  ;;  %v2250_v44 = vpop.f32.mrb[14].mxu0 }
 0x118   : > { %vm548_vm3 = vcmp.gt.f32.partialorder %v2250_v44, 0.0  ;;  %v524_v46 = vpop.f32.mrb[15].mxu0 }
 0x119   : > { %v2934_v47 = vsel %vm548_vm3, 1.0, %v2639_v0  ;;  %vm547_vm4 = vcmp.gt.f32.partialorder %v524_v46, 0.0  ;;  %2285 = vmatprep.mubr.msk.f32.mxu1 %vm581_vm1, %v577_v43 }
 0x11a   : > { %v2938_v48 = vsel %vm547_vm4, 1.0, %v2639_v0  ;;  %2286 = vmatmul.mubr.msk.f32.gmra.mrb[12].mxu1 %vm581_vm1, %v578_v45  ;;  %v580_v50 = vmul.f32 %v2250_v44, %v2934_v47 }
 0x11b   : > { %v579_v49 = vmul.f32 %v2938_v48, %v524_v46 }
 0x11d   : > { %2288 = vmatprep.mubr.msk.f32.mxu1 %vm581_vm1, %v579_v49 }
 0x11e   : > { %2289 = vmatmul.mubr.msk.f32.gmra.mrb[14].mxu1 %vm581_vm1, %v580_v50 }
 0x1d5   : > { %v2269_v51 = vpop.f32.mrb[0].mxu1 }
 0x1d6   : > { %vm800_vm5 = vcmp.gt.f32.partialorder %v2269_v51, 0.0  ;;  %v720_v52 = vpop.f32.mrb[1].mxu1 }
 0x1d7   : > { %v2946_v53 = vsel %vm800_vm5, 1.0, %v2639_v0  ;;  %vm799_vm6 = vcmp.gt.f32.partialorder %v720_v52, 0.0 }
 0x1d8   : > { %v2949_v54 = vsel %vm799_vm6, 1.0, %v2639_v0  ;;  %v832_v57 = vmul.f32 %v2269_v51, %v2946_v53 }
 0x1d9   : > { %v831_v55 = vmul.f32 %v2949_v54, %v720_v52  ;;  %v2272_v56 = vpop.f32.mrb[2].mxu1 }
 0x1da   : > { %vm802_vm7 = vcmp.gt.f32.partialorder %v2272_v56, 0.0  ;;  %v730_v58 = vpop.f32.mrb[3].mxu1 }
 0x1db   : > { %v2954_v59 = vsel %vm802_vm7, 1.0, %v2639_v0  ;;  %vm801_vm8 = vcmp.gt.f32.partialorder %v730_v58, 0.0  ;;  %2307 = vmatprep.mubr.msk.f32.mxu0 %vm581_vm1, %v831_v55  ;;  %v3035_v55 = vld [vmem:[%s3294_s4] ss:$0 sm:$0xff] }
 0x1dc   : > { %v2958_v60 = vsel %vm801_vm8, 1.0, %v2639_v0  ;;  %2308 = vmatmul.mubr.msk.f32.vlgmr.msra.gmra.mrb[16].mxu0 %vm581_vm1, %v832_v57  ;;  %v834_v63 = vmul.f32 %v2272_v56, %v2954_v59 }
 0x1dd   : > { %v833_v61 = vmul.f32 %v2958_v60, %v730_v58  ;;  %v2275_v62 = vpop.f32.mrb[4].mxu1  ;;  %2532 = vmatpush3.bf16.msra.mxu0 %v2720_v10 }
 0x1de   : > { %vm804_vm9 = vcmp.gt.f32.partialorder %v2275_v62, 0.0  ;;  %v740_v3 = vpop.f32.mrb[5].mxu1  ;;  %2534 = vmatprep.subr.bf16.mxu0 %v2731_v13 }
 0x1df   : > { %v2966_v4 = vsel %vm804_vm9, 1.0, %v2639_v0  ;;  %vm803_vm10 = vcmp.gt.f32.partialorder %v740_v3, 0.0  ;;  %2310 = vmatprep.mubr.msk.f32.mxu0 %vm581_vm1, %v833_v61 }
 0x1e0   : > { %v2970_v5 = vsel %vm803_vm10, 1.0, %v2639_v0  ;;  %2311 = vmatmul.mubr.msk.f32.gmra.mrb[18].mxu0 %vm581_vm1, %v834_v63  ;;  %v836_v9 = vmul.f32 %v2275_v62, %v2966_v4 }
 0x1e1   : > { %v835_v6 = vmul.f32 %v2970_v5, %v740_v3  ;;  %v2278_v10 = vpop.f32.mrb[6].mxu1  ;;  %2536 = vmatpush3.bf16.msra.mxu0 %v2731_v13 }
 0x1e2   : > { %vm806_vm11 = vcmp.gt.f32.partialorder %v2278_v10, 0.0  ;;  %v750_v11 = vpop.f32.mrb[7].mxu1  ;;  %2538 = vmatprep.subr.bf16.mxu0 %v2763_v21 }
 0x1e3   : > { %v2978_v12 = vsel %vm806_vm11, 1.0, %v2639_v0  ;;  %vm805_vm12 = vcmp.gt.f32.partialorder %v750_v11, 0.0  ;;  %2313 = vmatprep.mubr.msk.f32.mxu0 %vm581_vm1, %v835_v6 }
 0x1e4   : > { %v2982_v14 = vsel %vm805_vm12, 1.0, %v2639_v0  ;;  %2314 = vmatmul.mubr.msk.f32.gmra.mrb[20].mxu0 %vm581_vm1, %v836_v9  ;;  %v838_v18 = vmul.f32 %v2278_v10, %v2978_v12 }
 0x1e5   : > { %v837_v17 = vmul.f32 %v2982_v14, %v750_v11  ;;  %v2281_v13 = vpop.f32.mrb[8].mxu1  ;;  %2540 = vmatpush3.bf16.msra.mxu0 %v2763_v21 }
 0x1e6   : > { %vm808_vm13 = vcmp.gt.f32.partialorder %v2281_v13, 0.0  ;;  %v760_v19 = vpop.f32.mrb[9].mxu1  ;;  %2542 = vmatprep.subr.bf16.mxu0 %v2787_v27 }
 0x1e7   : > { %v2990_v20 = vsel %vm808_vm13, 1.0, %v2639_v0  ;;  %vm807_vm14 = vcmp.gt.f32.partialorder %v760_v19, 0.0  ;;  %2316 = vmatprep.mubr.msk.f32.mxu0 %vm581_vm1, %v837_v17 }
 0x1e8   : > { %v2994_v24 = vsel %vm807_vm14, 1.0, %v2639_v0  ;;  %2317 = vmatmul.mubr.msk.f32.gmra.mrb[22].mxu0 %vm581_vm1, %v838_v18  ;;  %v840_v26 = vmul.f32 %v2281_v13, %v2990_v20 }
 0x1e9   : > { %v839_v25 = vmul.f32 %v2994_v24, %v760_v19  ;;  %v2284_v21 = vpop.f32.mrb[10].mxu1  ;;  %2544 = vmatpush3.bf16.msra.mxu0 %v2787_v27 }
 0x1ea   : > { %vm810_vm15 = vcmp.gt.f32.partialorder %v2284_v21, 0.0  ;;  %v770_v28 = vpop.f32.mrb[11].mxu1 }
 0x1eb   : > { %v3001_v31 = vsel %vm810_vm15, 1.0, %v2639_v0  ;;  %vm809_vm0 = vcmp.gt.f32.partialorder %v770_v28, 0.0  ;;  %2319 = vmatprep.mubr.msk.f32.mxu0 %vm581_vm1, %v839_v25 }
 0x1ec   : > { %v3005_v32 = vsel %vm809_vm0, 1.0, %v2639_v0  ;;  %2320 = vmatmul.mubr.msk.f32.gmra.mrb[24].mxu0 %vm581_vm1, %v840_v26  ;;  %v842_v27 = vmul.f32 %v2284_v21, %v3001_v31 }
 0x1ed   : > { %v841_v33 = vmul.f32 %v3005_v32, %v770_v28  ;;  %v2287_v34 = vpop.f32.mrb[12].mxu1 }
 0x1ee   : > { %vm812_vm2 = vcmp.gt.f32.partialorder %v2287_v34, 0.0  ;;  %v780_v37 = vpop.f32.mrb[13].mxu1 }
 0x1ef   : > { %v3011_v38 = vsel %vm812_vm2, 1.0, %v2639_v0  ;;  %vm811_vm3 = vcmp.gt.f32.partialorder %v780_v37, 0.0  ;;  %2322 = vmatprep.mubr.msk.f32.mxu0 %vm581_vm1, %v841_v33 }
 0x1f0   : > { %v3015_v39 = vsel %vm811_vm3, 1.0, %v2639_v0  ;;  %2323 = vmatmul.mubr.msk.f32.gmra.mrb[26].mxu0 %vm581_vm1, %v842_v27  ;;  %v844_v44 = vmul.f32 %v2287_v34, %v3011_v38 }
 0x1f1   : > { %v843_v40 = vmul.f32 %v3015_v39, %v780_v37  ;;  %v2290_v43 = vpop.f32.mrb[14].mxu1 }
 0x1f2   : > { %vm814_vm4 = vcmp.gt.f32.partialorder %v2290_v43, 0.0  ;;  %v790_v45 = vpop.f32.mrb[15].mxu1 }
 0x1f3   : > { %v3021_v46 = vsel %vm814_vm4, 1.0, %v2639_v0  ;;  %vm813_vm5 = vcmp.gt.f32.partialorder %v790_v45, 0.0  ;;  %2325 = vmatprep.mubr.msk.f32.mxu0 %vm581_vm1, %v843_v40 }
 0x1f4   : > { %v3025_v49 = vsel %vm813_vm5, 1.0, %v2639_v0  ;;  %2326 = vmatmul.mubr.msk.f32.gmra.mrb[28].mxu0 %vm581_vm1, %v844_v44  ;;  %v846_v51 = vmul.f32 %v2290_v43, %v3021_v46 }
 0x1f5   : > { %v845_v50 = vmul.f32 %v3025_v49, %v790_v45 }
 0x1f7   : > { %2328 = vmatprep.mubr.msk.f32.mxu0 %vm581_vm1, %v845_v50 }
 0x1f8   : > { %2329 = vmatmul.mubr.msk.f32.gmra.mrb[30].mxu0 %vm581_vm1, %v846_v51 }
 0x2af   : > { %v2309_v52 = vpop.f32.mrb[16].mxu0 }
 0x2b0   : > { %vm1065_vm6 = vcmp.gt.f32.partialorder %v2309_v52, 0.0  ;;  %v985_v56 = vpop.f32.mrb[17].mxu0 }
 0x2b1   : > { %v1081_v57 = vsel %vm1065_vm6, 1.0, %v2639_v0  ;;  %vm1064_vm7 = vcmp.gt.f32.partialorder %v985_v56, 0.0 }
 0x2b2   : > { %v3038_v58 = vmul.f32 %v2309_v52, %v1081_v57  ;;  %v1080_v61 = vsel %vm1064_vm7, 1.0, %v2639_v0  ;;  %v1119_v6 = vmul.f32 %v3035_v55, %v1081_v57  ;;  %vm1844_vm7 = vcmask 195584  }
 0x2b3   : > { %v3041_v62 = vmul.f32 %v1080_v61, %v985_v56  ;;  %v1118_v63 = vmul.f32 %v3035_v55, %v1080_v61  ;;  %v2312_v3 = vpop.f32.mrb[18].mxu0 }
 0x2b4   : > { %vm1067_vm8 = vcmp.gt.f32.partialorder %v2312_v3, 0.0  ;;  %v995_v10 = vpop.f32.mrb[19].mxu0 }
 0x2b5   : > { %v1083_v9 = vsel %vm1067_vm8, 1.0, %v2639_v0  ;;  %vm1066_vm9 = vcmp.gt.f32.partialorder %v995_v10, 0.0  ;;  %2347 = vmatprep.mubr.msk.f32.mxu1 %vm581_vm1, %v1118_v63 }
 0x2b6   : > { %v3047_v11 = vmul.f32 %v2312_v3, %v1083_v9  ;;  %v1082_v17 = vsel %vm1066_vm9, 1.0, %v2639_v0  ;;  %2348 = vmatmul.mubr.msk.f32.vlgmr.msra.gmra.mrb[16].mxu1 %vm581_vm1, %v1119_v6  ;;  %v1121_v25 = vmul.f32 %v3035_v55, %v1083_v9 }
 0x2b7   : > { %v3051_v13 = vmul.f32 %v1082_v17, %v995_v10  ;;  %v1120_v18 = vmul.f32 %v3035_v55, %v1082_v17  ;;  %v2315_v19 = vpop.f32.mrb[20].mxu0 }
 0x2b8   : > { %vm1069_vm10 = vcmp.gt.f32.partialorder %v2315_v19, 0.0  ;;  %v1005_v21 = vpop.f32.mrb[21].mxu0 }
 0x2b9   : > { %v1085_v26 = vsel %vm1069_vm10, 1.0, %v2639_v0  ;;  %vm1068_vm11 = vcmp.gt.f32.partialorder %v1005_v21, 0.0  ;;  %2350 = vmatprep.mubr.msk.f32.mxu1 %vm581_vm1, %v1120_v18 }
 0x2ba   : > { %v3057_v28 = vmul.f32 %v2315_v19, %v1085_v26  ;;  %v1084_v33 = vsel %vm1068_vm11, 1.0, %v2639_v0  ;;  %2351 = vmatmul.mubr.msk.f32.gmra.mrb[18].mxu1 %vm581_vm1, %v1121_v25  ;;  %v1123_v40 = vmul.f32 %v3035_v55, %v1085_v26 }
 0x2bb   : > { %v3061_v34 = vmul.f32 %v1084_v33, %v1005_v21  ;;  %v1122_v27 = vmul.f32 %v3035_v55, %v1084_v33  ;;  %v2318_v37 = vpop.f32.mrb[22].mxu0 }
 0x2bc   : > { %vm1071_vm12 = vcmp.gt.f32.partialorder %v2318_v37, 0.0  ;;  %v1015_v43 = vpop.f32.mrb[23].mxu0 }
 0x2bd   : > { %v1087_v44 = vsel %vm1071_vm12, 1.0, %v2639_v0  ;;  %vm1070_vm13 = vcmp.gt.f32.partialorder %v1015_v43, 0.0  ;;  %2353 = vmatprep.mubr.msk.f32.mxu1 %vm581_vm1, %v1122_v27 }
 0x2be   : > { %v3067_v45 = vmul.f32 %v2318_v37, %v1087_v44  ;;  %v1086_v50 = vsel %vm1070_vm13, 1.0, %v2639_v0  ;;  %2354 = vmatmul.mubr.msk.f32.gmra.mrb[20].mxu1 %vm581_vm1, %v1123_v40  ;;  %v1125_v57 = vmul.f32 %v3035_v55, %v1087_v44 }
 0x2bf   : > { %v3071_v51 = vmul.f32 %v1086_v50, %v1015_v43  ;;  %v1124_v52 = vmul.f32 %v3035_v55, %v1086_v50  ;;  %v2321_v56 = vpop.f32.mrb[24].mxu0 }
 0x2c0   : > { %vm1073_vm14 = vcmp.gt.f32.partialorder %v2321_v56, 0.0  ;;  %v1025_v61 = vpop.f32.mrb[25].mxu0 }
 0x2c1   : > { %v1089_v63 = vsel %vm1073_vm14, 1.0, %v2639_v0  ;;  %vm1072_vm15 = vcmp.gt.f32.partialorder %v1025_v61, 0.0  ;;  %2356 = vmatprep.mubr.msk.f32.mxu1 %vm581_vm1, %v1124_v52 }
 0x2c2   : > { %v3077_v3 = vmul.f32 %v2321_v56, %v1089_v63  ;;  %v1088_v6 = vsel %vm1072_vm15, 1.0, %v2639_v0  ;;  %2357 = vmatmul.mubr.msk.f32.gmra.mrb[22].mxu1 %vm581_vm1, %v1125_v57  ;;  %v1127_v18 = vmul.f32 %v3035_v55, %v1089_v63 }
 0x2c3   : > { %v3081_v10 = vmul.f32 %v1088_v6, %v1025_v61  ;;  %v1126_v9 = vmul.f32 %v3035_v55, %v1088_v6  ;;  %v2324_v17 = vpop.f32.mrb[26].mxu0 }
 0x2c4   : > { %vm1075_vm0 = vcmp.gt.f32.partialorder %v2324_v17, 0.0  ;;  %v1035_v19 = vpop.f32.mrb[27].mxu0 }
 0x2c5   : > { %v1091_v25 = vsel %vm1075_vm0, 1.0, %v2639_v0  ;;  %vm1074_vm2 = vcmp.gt.f32.partialorder %v1035_v19, 0.0  ;;  %2359 = vmatprep.mubr.msk.f32.mxu1 %vm581_vm1, %v1126_v9 }
 0x2c6   : > { %v3087_v21 = vmul.f32 %v2324_v17, %v1091_v25  ;;  %v1090_v26 = vsel %vm1074_vm2, 1.0, %v2639_v0  ;;  %2360 = vmatmul.mubr.msk.f32.gmra.mrb[24].mxu1 %vm581_vm1, %v1127_v18  ;;  %v1129_v40 = vmul.f32 %v3035_v55, %v1091_v25 }
 0x2c7   : > { %v3091_v33 = vmul.f32 %v1090_v26, %v1035_v19  ;;  %v1128_v27 = vmul.f32 %v3035_v55, %v1090_v26  ;;  %v2327_v37 = vpop.f32.mrb[28].mxu0 }
 0x2c8   : > { %vm1077_vm3 = vcmp.gt.f32.partialorder %v2327_v37, 0.0  ;;  %v1045_v43 = vpop.f32.mrb[29].mxu0 }
 0x2c9   : > { %v1093_v44 = vsel %vm1077_vm3, 1.0, %v2639_v0  ;;  %vm1076_vm4 = vcmp.gt.f32.partialorder %v1045_v43, 0.0  ;;  %2362 = vmatprep.mubr.msk.f32.mxu1 %vm581_vm1, %v1128_v27 }
 0x2ca   : > { %v3097_v50 = vmul.f32 %v2327_v37, %v1093_v44  ;;  %v1092_v52 = vsel %vm1076_vm4, 1.0, %v2639_v0  ;;  %2363 = vmatmul.mubr.msk.f32.gmra.mrb[26].mxu1 %vm581_vm1, %v1129_v40  ;;  %v1131_v63 = vmul.f32 %v3035_v55, %v1093_v44 }
 0x2cb   : > { %v3101_v56 = vmul.f32 %v1092_v52, %v1045_v43  ;;  %v1130_v57 = vmul.f32 %v3035_v55, %v1092_v52  ;;  %v2330_v61 = vpop.f32.mrb[30].mxu0 }
 0x2cc   : > { %vm1079_vm5 = vcmp.gt.f32.partialorder %v2330_v61, 0.0  ;;  %v1055_v6 = vpop.f32.mrb[31].mxu0 }
 0x2cd   : > { %v1095_v9 = vsel %vm1079_vm5, 1.0, %v2639_v0  ;;  %vm1078_vm6 = vcmp.gt.f32.partialorder %v1055_v6, 0.0  ;;  %2365 = vmatprep.mubr.msk.f32.mxu1 %vm581_vm1, %v1130_v57 }
 0x2ce   : > { %v3107_v17 = vmul.f32 %v2330_v61, %v1095_v9  ;;  %v1094_v18 = vsel %vm1078_vm6, 1.0, %v2639_v0  ;;  %2366 = vmatmul.mubr.msk.f32.gmra.mrb[28].mxu1 %vm581_vm1, %v1131_v63  ;;  %v1133_v26 = vmul.f32 %v3035_v55, %v1095_v9 }
 0x2cf   : > { %v3111_v19 = vmul.f32 %v1094_v18, %v1055_v6  ;;  %v1132_v25 = vmul.f32 %v3035_v55, %v1094_v18 }
 0x2d1   : > { %2368 = vmatprep.mubr.msk.f32.mxu1 %vm581_vm1, %v1132_v25 }
 0x2d2   : > { %2369 = vmatmul.mubr.msk.f32.gmra.mrb[30].mxu1 %vm581_vm1, %v1133_v26 }
 0x389   : > { %v2349_v27 = vpop.f32.mrb[16].mxu1 }
 0x38a   : > { %v1248_v37 = vpop.f32.mrb[17].mxu1  ;;  %v1328_v43 = vmul.f32 %v2349_v27, %v2946_v53 }
 0x38b   : > { %v1327_v40 = vmul.f32 %v1248_v37, %v2949_v54 }
 0x38d   : > { %v2352_v44 = vpop.f32.mrb[18].mxu1  ;;  %2387 = vmatprep.mubr.msk.f32.mxu0 %vm581_vm1, %v1327_v40 }
 0x38e   : > { %v1258_v0 = vpop.f32.mrb[19].mxu1  ;;  %2388 = vmatmul.mubr.msk.f32.vlgmr.msra.gmra.mrb[32].mxu0 %vm581_vm1, %v1328_v43  ;;  %v1330_v55 = vmul.f32 %v2352_v44, %v2954_v59 }
 0x38f   : > { %v1329_v52 = vmul.f32 %v1258_v0, %v2958_v60  ;;  %v314_v0 = vld [vmem:[%s3295_s5 + $0x10] sm:$0xff] }
 0x391   : > { %v2355_v57 = vpop.f32.mrb[20].mxu1  ;;  %2390 = vmatprep.mubr.msk.f32.mxu0 %vm581_vm1, %v1329_v52 }
 0x392   : > { %v1268_v61 = vpop.f32.mrb[21].mxu1  ;;  %2391 = vmatmul.mubr.msk.f32.gmra.mrb[34].mxu0 %vm581_vm1, %v1330_v55  ;;  %v1332_v53 = vmul.f32 %v2355_v57, %v2966_v4 }
 0x393   : > { %v1331_v54 = vmul.f32 %v1268_v61, %v2970_v5 }
 0x395   : > { %v2358_v63 = vpop.f32.mrb[22].mxu1  ;;  %2393 = vmatprep.mubr.msk.f32.mxu0 %vm581_vm1, %v1331_v54 }
 0x396   : > { %v1278_v6 = vpop.f32.mrb[23].mxu1  ;;  %2394 = vmatmul.mubr.msk.f32.gmra.mrb[36].mxu0 %vm581_vm1, %v1332_v53  ;;  %v1334_v59 = vmul.f32 %v2358_v63, %v2978_v12 }
 0x397   : > { %v1333_v60 = vmul.f32 %v1278_v6, %v2982_v14 }
 0x399   : > { %v2361_v9 = vpop.f32.mrb[24].mxu1  ;;  %2396 = vmatprep.mubr.msk.f32.mxu0 %vm581_vm1, %v1333_v60 }
 0x39a   : > { %v1288_v18 = vpop.f32.mrb[25].mxu1  ;;  %2397 = vmatmul.mubr.msk.f32.gmra.mrb[38].mxu0 %vm581_vm1, %v1334_v59  ;;  %v1336_v4 = vmul.f32 %v2361_v9, %v2990_v20 }
 0x39b   : > { %v1335_v5 = vmul.f32 %v1288_v18, %v2994_v24 }
 0x39d   : > { %v2364_v25 = vpop.f32.mrb[26].mxu1  ;;  %2399 = vmatprep.mubr.msk.f32.mxu0 %vm581_vm1, %v1335_v5 }
 0x39e   : > { %v1298_v26 = vpop.f32.mrb[27].mxu1  ;;  %2400 = vmatmul.mubr.msk.f32.gmra.mrb[40].mxu0 %vm581_vm1, %v1336_v4  ;;  %v1338_v12 = vmul.f32 %v2364_v25, %v3001_v31 }
 0x39f   : > { %v1337_v14 = vmul.f32 %v1298_v26, %v3005_v32 }
 0x3a1   : > { %v2367_v27 = vpop.f32.mrb[28].mxu1  ;;  %2402 = vmatprep.mubr.msk.f32.mxu0 %vm581_vm1, %v1337_v14 }
 0x3a2   : > { %v1308_v37 = vpop.f32.mrb[29].mxu1  ;;  %2403 = vmatmul.mubr.msk.f32.gmra.mrb[42].mxu0 %vm581_vm1, %v1338_v12  ;;  %v1340_v20 = vmul.f32 %v2367_v27, %v3011_v38  ;;  %v313_v38 = vld [vmem:[%s3295_s5 + $0x8] sm:$0xff] }
 0x3a3   : > { %v1339_v24 = vmul.f32 %v1308_v37, %v3015_v39  ;;  %v312_v39 = vld [vmem:[%s3295_s5] sm:$0xff] }
 0x3a4   : > { %v2545_v44 = vpack.c.bf16 %v313_v38, %v312_v39 }
 0x3a5   : > { %v2370_v40 = vpop.f32.mrb[30].mxu1  ;;  %2405 = vmatprep.mubr.msk.f32.mxu0 %vm581_vm1, %v1339_v24 }
 0x3a6   : > { %v1318_v43 = vpop.f32.mrb[31].mxu1  ;;  %2406 = vmatmul.mubr.msk.f32.gmra.mrb[44].mxu0 %vm581_vm1, %v1340_v20  ;;  %v1342_v31 = vmul.f32 %v2370_v40, %v3021_v46  ;;  %2546 = vmatprep.subr.bf16.mxu1 %v2545_v44 }
 0x3a7   : > { %v1341_v32 = vmul.f32 %v1318_v43, %v3025_v49  ;;  %2548 = vmatpush3.bf16.xpose.msra.mxu1 %v2545_v44 }
 0x3a8   : > { %2415 = vmatprep.subr.mxu1 %v314_v0 }
 0x3a9   : > { %2408 = vmatprep.mubr.msk.f32.mxu0 %vm581_vm1, %v1341_v32 }
 0x3aa   : > { %2409 = vmatmul.mubr.msk.f32.gmra.mrb[46].mxu0 %vm581_vm1, %v1342_v31 }
 0x3af   : > { %2416 = vmatpush3.xpose.msra.mxu1 %v314_v0 }
 0x461   : > { %v2389_v46 = vpop.f32.mrb[32].mxu0 }
 0x462   : > { %v1537_v49 = vmul.f32 %v2389_v46, %v2866_v1  ;;  %v1457_v52 = vpop.f32.mrb[33].mxu0 }
 0x463   : > { %v1536_v55 = vmul.f32 %v1457_v52, %v2869_v2 }
 0x465   : > { %v2392_v57 = vpop.f32.mrb[34].mxu0  ;;  %v2559_v61 = vpack.i.bf16 %v1537_v49, %v1536_v55 }
 0x466   : > { %v1539_v54 = vmul.f32 %v2392_v57, %v2874_v7  ;;  %v1467_v53 = vpop.f32.mrb[35].mxu0 }
 0x467   : > { %v1538_v63 = vmul.f32 %v1467_v53, %v2878_v8  ;;  %2560 = vrot.lane.b32.xlu0 %v2559_v61, %s2640_s16 }
 0x469   : > { %v2564_v6 = vpack.i.bf16 %v1539_v54, %v1538_v63  ;;  %v2395_v60 = vpop.f32.mrb[36].mxu0 }
 0x46a   : > { %v1541_v59 = vmul.f32 %v2395_v60, %v2884_v15  ;;  %v1477_v9 = vpop.f32.mrb[37].mxu0 }
 0x46b   : > { %v1540_v1 = vmul.f32 %v1477_v9, %v2888_v16  ;;  %2565 = vrot.lane.b32.xlu0 %v2564_v6, %s2640_s16 }
 0x46d   : > { %v2398_v2 = vpop.f32.mrb[38].mxu0  ;;  %v2569_v18 = vpack.i.bf16 %v1541_v59, %v1540_v1 }
 0x46e   : > { %v1543_v5 = vmul.f32 %v2398_v2, %v2894_v22  ;;  %v1487_v7 = vpop.f32.mrb[39].mxu0 }
 0x46f   : > { %v1542_v4 = vmul.f32 %v1487_v7, %v2898_v23  ;;  %2570 = vrot.lane.b32.xlu1 %v2569_v18, %s2640_s16 }
 0x471   : > { %v2574_v8 = vpack.i.bf16 %v1543_v5, %v1542_v4  ;;  %v2401_v25 = vpop.f32.mrb[40].mxu0 }
 0x472   : > { %v1545_v26 = vmul.f32 %v2401_v25, %v2904_v29  ;;  %v1497_v14 = vpop.f32.mrb[41].mxu0 }
 0x473   : > { %v1544_v15 = vmul.f32 %v1497_v14, %v2908_v30  ;;  %2575 = vrot.lane.b32.xlu1 %v2574_v8, %s2640_s16 }
 0x475   : > { %v2579_v16 = vpack.i.bf16 %v1545_v26, %v1544_v15  ;;  %v2404_v12 = vpop.f32.mrb[42].mxu0  ;;  %v1777_v15 = vlaneseq }
 0x476   : > { %v1547_v27 = vmul.f32 %v2404_v12, %v2914_v35  ;;  %v1507_v37 = vpop.f32.mrb[43].mxu0 }
 0x477   : > { %v1546_v22 = vmul.f32 %v1507_v37, %v2918_v36  ;;  %2580 = vrot.lane.b32.xlu0 %v2579_v16, %s2640_s16  ;;  %v3214_v37 = vand.u32 127, %v1777_v15 }
 0x479   : > { %v2584_v23 = vpack.i.bf16 %v1547_v27, %v1546_v22  ;;  %v2407_v24 = vpop.f32.mrb[44].mxu0 }
 0x47a   : > { %v1549_v20 = vmul.f32 %v2407_v24, %v2924_v41  ;;  %v1517_v40 = vpop.f32.mrb[45].mxu0 }
 0x47b   : > { %v1548_v29 = vmul.f32 %v1517_v40, %v2928_v42  ;;  %2585 = vrot.lane.b32.xlu1 %v2584_v23, %s2640_s16 }
 0x47d   : > { %v2589_v30 = vpack.i.bf16 %v1549_v20, %v1548_v29  ;;  %v2410_v43 = vpop.f32.mrb[46].mxu0 }
 0x47e   : > { %v1551_v32 = vmul.f32 %v2410_v43, %v2934_v47  ;;  %v1527_v31 = vpop.f32.mrb[47].mxu0 }
 0x47f   : > { %v1550_v35 = vmul.f32 %v1527_v31, %v2938_v48  ;;  %2590 = vrot.lane.b32.xlu0 %v2589_v30, %s2640_s16 }
 0x481   : > { %v2594_v36 = vpack.i.bf16 %v1551_v32, %v1550_v35 }
 0x483   : > { %2595 = vrot.lane.b32.xlu1 %v2594_v36, %s2640_s16 }
 0x4d9   : > { %v2561_v39 = vpop.permute.xlu0 %2560 }
 0x4da   : > { %v2563_v38 = vunpack.i.h.bf16 %v2561_v39  ;;  %v2562_v41 = vunpack.i.l.bf16 %v2561_v39 }
 0x4dc   : > { %v1616_v42 = vsel %vm581_vm1, %v3041_v62, %v2562_v41  ;;  %v1617_v44 = vsel %vm581_vm1, %v3038_v58, %v2563_v38 }
 0x4dd   : > { %v2566_v0 = vpop.permute.xlu0 %2565  ;;  %2417 = vmatprep.mubr.f32.mxu1 %v1616_v42 }
 0x4de   : > { %v2568_v47 = vunpack.i.h.bf16 %v2566_v0  ;;  %v2567_v46 = vunpack.i.l.bf16 %v2566_v0  ;;  %2418 = vmatmul.mubr.f32.vlgmr.msra.gmra.mrb[32].mxu1 %v1617_v44 }
 0x4e0   : > { %v1618_v48 = vsel %vm581_vm1, %v3051_v13, %v2567_v46  ;;  %v1619_v49 = vsel %vm581_vm1, %v3047_v11, %v2568_v47 }
 0x4e1   : > { %v2571_v52 = vpop.permute.xlu1 %2570  ;;  %2420 = vmatprep.mubr.f32.mxu1 %v1618_v48 }
 0x4e2   : > { %v2573_v55 = vunpack.i.h.bf16 %v2571_v52  ;;  %v2572_v57 = vunpack.i.l.bf16 %v2571_v52  ;;  %2421 = vmatmul.mubr.f32.gmra.mrb[34].mxu1 %v1619_v49 }
 0x4e4   : > { %v1620_v62 = vsel %vm581_vm1, %v3061_v34, %v2572_v57  ;;  %v1621_v58 = vsel %vm581_vm1, %v3057_v28, %v2573_v55 }
 0x4e5   : > { %v2576_v61 = vpop.permute.xlu1 %2575  ;;  %2423 = vmatprep.mubr.f32.mxu1 %v1620_v62 }
 0x4e6   : > { %v2578_v54 = vunpack.i.h.bf16 %v2576_v61  ;;  %v2577_v53 = vunpack.i.l.bf16 %v2576_v61  ;;  %2424 = vmatmul.mubr.f32.gmra.mrb[36].mxu1 %v1621_v58 }
 0x4e8   : > { %v1622_v13 = vsel %vm581_vm1, %v3071_v51, %v2577_v53  ;;  %v1623_v11 = vsel %vm581_vm1, %v3067_v45, %v2578_v54 }
 0x4e9   : > { %v2581_v63 = vpop.permute.xlu0 %2580  ;;  %2426 = vmatprep.mubr.f32.mxu1 %v1622_v13 }
 0x4ea   : > { %v2583_v6 = vunpack.i.h.bf16 %v2581_v63  ;;  %v2582_v60 = vunpack.i.l.bf16 %v2581_v63  ;;  %2427 = vmatmul.mubr.f32.gmra.mrb[38].mxu1 %v1623_v11 }
 0x4ec   : > { %v1624_v34 = vsel %vm581_vm1, %v3081_v10, %v2582_v60  ;;  %v1625_v28 = vsel %vm581_vm1, %v3077_v3, %v2583_v6 }
 0x4ed   : > { %v2586_v59 = vpop.permute.xlu1 %2585  ;;  %2429 = vmatprep.mubr.f32.mxu1 %v1624_v34 }
 0x4ee   : > { %v2588_v9 = vunpack.i.h.bf16 %v2586_v59  ;;  %v2587_v1 = vunpack.i.l.bf16 %v2586_v59  ;;  %2430 = vmatmul.mubr.f32.gmra.mrb[40].mxu1 %v1625_v28 }
 0x4f0   : > { %v1626_v51 = vsel %vm581_vm1, %v3091_v33, %v2587_v1  ;;  %v1627_v45 = vsel %vm581_vm1, %v3087_v21, %v2588_v9 }
 0x4f1   : > { %v2591_v2 = vpop.permute.xlu0 %2590  ;;  %2432 = vmatprep.mubr.f32.mxu1 %v1626_v51 }
 0x4f2   : > { %v2593_v18 = vunpack.i.h.bf16 %v2591_v2  ;;  %v2592_v5 = vunpack.i.l.bf16 %v2591_v2  ;;  %2433 = vmatmul.mubr.f32.gmra.mrb[42].mxu1 %v1627_v45 }
 0x4f4   : > { %v1628_v10 = vsel %vm581_vm1, %v3101_v56, %v2592_v5  ;;  %v1629_v3 = vsel %vm581_vm1, %v3097_v50, %v2593_v18 }
 0x4f5   : > { %2435 = vmatprep.mubr.f32.mxu1 %v1628_v10  ;;  %v2596_v7 = vpop.permute.xlu1 %2595 }
 0x4f6   : > { %v2598_v4 = vunpack.i.h.bf16 %v2596_v7  ;;  %v2597_v8 = vunpack.i.l.bf16 %v2596_v7  ;;  %2436 = vmatmul.mubr.f32.gmra.mrb[44].mxu1 %v1629_v3 }
 0x4f8   : > { %v1630_v33 = vsel %vm581_vm1, %v3111_v19, %v2597_v8  ;;  %v1631_v21 = vsel %vm581_vm1, %v3107_v17, %v2598_v4  ;;  %vm1779_vm1 = vcmp.lt.s32.totalorder %v3214_v37, 12 }
 0x4f9   : > { %2438 = vmatprep.mubr.f32.mxu1 %v1630_v33 }
 0x4fa   : > { %2439 = vmatmul.mubr.f32.gmra.mrb[46].mxu1 %v1631_v21 }
 0x5b1   : > { %v2419_v25 = vpop.f32.mrb[32].mxu1 }
 0x5b2   : > { %v1781_v26 = vand.u32 2147483647, %v2419_v25  ;;  %v1698_v14 = vpop.f32.mrb[33].mxu1 }
 0x5b3   : > { %v1780_v56 = vand.u32 2147483647, %v1698_v14 }
 0x5b4   : > { %2599 = vlog2.f32 %v1781_v26 }
 0x5b5   : > { %2601 = vlog2.f32 %v1780_v56  ;;  %v2422_v50 = vpop.f32.mrb[34].mxu1 }
 0x5b6   : > { %v1783_v16 = vand.u32 2147483647, %v2422_v50  ;;  %v1708_v12 = vpop.f32.mrb[35].mxu1 }
 0x5b7   : > { %v1782_v27 = vand.u32 2147483647, %v1708_v12 }
 0x5b8   : > { %2603 = vlog2.f32 %v1783_v16 }
 0x5b9   : > { %2605 = vlog2.f32 %v1782_v27  ;;  %v2425_v19 = vpop.f32.mrb[36].mxu1 }
 0x5ba   : > { %v1785_v17 = vand.u32 2147483647, %v2425_v19  ;;  %v1718_v22 = vpop.f32.mrb[37].mxu1 }
 0x5bb   : > { %v1784_v23 = vand.u32 2147483647, %v1718_v22 }
 0x5bc   : > { %2607 = vlog2.f32 %v1785_v17 }
 0x5bd   : > { %2609 = vlog2.f32 %v1784_v23  ;;  %v2428_v24 = vpop.f32.mrb[38].mxu1 }
 0x5be   : > { %v2600_v20 = vpop.eup %2599  ;;  %v1787_v40 = vand.u32 2147483647, %v2428_v24  ;;  %v1728_v29 = vpop.f32.mrb[39].mxu1 }
 0x5bf   : > { %v2602_v30 = vpop.eup %2601  ;;  %v1799_v43 = vmul.f32 0.6931472, %v2600_v20  ;;  %v1786_v32 = vand.u32 2147483647, %v1728_v29 }
 0x5c0   : > { %v1797_v31 = vmul.f32 0.6931472, %v2602_v30  ;;  %2611 = vlog2.f32 %v1787_v40 }
 0x5c1   : > { %v1829_v35 = vsel %vm1779_vm1, %v2419_v25, %v1799_v43  ;;  %2613 = vlog2.f32 %v1786_v32  ;;  %v2431_v36 = vpop.f32.mrb[40].mxu1 }
 0x5c2   : > { %v2604_v39 = vpop.eup %2603  ;;  %1846 = vst.msk [vmem:[%s3221_s20 + $0x8] sm:$0xff] %vm1844_vm7, %v1829_v35  ;;  %v1828_v38 = vsel %vm1779_vm1, %v1698_v14, %v1797_v31  ;;  %v1789_v41 = vand.u32 2147483647, %v2431_v36  ;;  %v1738_v42 = vpop.f32.mrb[41].mxu1 }
 0x5c3   : > { %v2606_v44 = vpop.eup %2605  ;;  %1845 = vst.msk [vmem:[%s3221_s20] sm:$0xff] %vm1844_vm7, %v1828_v38  ;;  %v1803_v0 = vmul.f32 0.6931472, %v2604_v39  ;;  %v1788_v47 = vand.u32 2147483647, %v1738_v42 }
 0x5c4   : > { %v1801_v46 = vmul.f32 0.6931472, %v2606_v44  ;;  %2615 = vlog2.f32 %v1789_v41 }
 0x5c5   : > { %v1831_v48 = vsel %vm1779_vm1, %v2422_v50, %v1803_v0  ;;  %2617 = vlog2.f32 %v1788_v47  ;;  %v2434_v49 = vpop.f32.mrb[42].mxu1 }
 0x5c6   : > { %v2608_v52 = vpop.eup %2607  ;;  %1848 = vst.msk [vmem:[%s3221_s20 + $0x18] sm:$0xff] %vm1844_vm7, %v1831_v48  ;;  %v1830_v55 = vsel %vm1779_vm1, %v1708_v12, %v1801_v46  ;;  %v1791_v57 = vand.u32 2147483647, %v2434_v49  ;;  %v1748_v62 = vpop.f32.mrb[43].mxu1 }
 0x5c7   : > { %v2610_v58 = vpop.eup %2609  ;;  %1847 = vst.msk [vmem:[%s3221_s20 + $0x10] sm:$0xff] %vm1844_vm7, %v1830_v55  ;;  %v1807_v61 = vmul.f32 0.6931472, %v2608_v52  ;;  %v1790_v54 = vand.u32 2147483647, %v1748_v62 }
 0x5c8   : > { %v1805_v53 = vmul.f32 0.6931472, %v2610_v58  ;;  %2619 = vlog2.f32 %v1791_v57 }
 0x5c9   : > { %v1833_v13 = vsel %vm1779_vm1, %v2425_v19, %v1807_v61  ;;  %2621 = vlog2.f32 %v1790_v54  ;;  %v2437_v11 = vpop.f32.mrb[44].mxu1 }
 0x5ca   : > { %v2612_v63 = vpop.eup %2611  ;;  %1850 = vst.msk [vmem:[%s3221_s20 + $0x28] sm:$0xff] %vm1844_vm7, %v1833_v13  ;;  %v1832_v6 = vsel %vm1779_vm1, %v1718_v22, %v1805_v53  ;;  %v1793_v60 = vand.u32 2147483647, %v2437_v11  ;;  %v1758_v34 = vpop.f32.mrb[45].mxu1 }
 0x5cb   : > { %v2614_v28 = vpop.eup %2613  ;;  %1849 = vst.msk [vmem:[%s3221_s20 + $0x20] sm:$0xff] %vm1844_vm7, %v1832_v6  ;;  %v1811_v59 = vmul.f32 0.6931472, %v2612_v63  ;;  %v1792_v9 = vand.u32 2147483647, %v1758_v34 }
 0x5cc   : > { %v1809_v1 = vmul.f32 0.6931472, %v2614_v28  ;;  %2623 = vlog2.f32 %v1793_v60 }
 0x5cd   : > { %v1835_v51 = vsel %vm1779_vm1, %v2428_v24, %v1811_v59  ;;  %2625 = vlog2.f32 %v1792_v9  ;;  %v2440_v45 = vpop.f32.mrb[46].mxu1 }
 0x5ce   : > { %v2616_v2 = vpop.eup %2615  ;;  %1852 = vst.msk [vmem:[%s3221_s20 + $0x38] sm:$0xff] %vm1844_vm7, %v1835_v51  ;;  %v1834_v18 = vsel %vm1779_vm1, %v1728_v29, %v1809_v1  ;;  %v1795_v5 = vand.u32 2147483647, %v2440_v45  ;;  %v1768_v10 = vpop.f32.mrb[47].mxu1 }
 0x5cf   : > { %v2618_v3 = vpop.eup %2617  ;;  %1851 = vst.msk [vmem:[%s3221_s20 + $0x30] sm:$0xff] %vm1844_vm7, %v1834_v18  ;;  %v1815_v7 = vmul.f32 0.6931472, %v2616_v2  ;;  %v1794_v4 = vand.u32 2147483647, %v1768_v10 }
 0x5d0   : > { %v1813_v8 = vmul.f32 0.6931472, %v2618_v3  ;;  %2627 = vlog2.f32 %v1795_v5 }
 0x5d1   : > { %v1837_v33 = vsel %vm1779_vm1, %v2431_v36, %v1815_v7  ;;  %2629 = vlog2.f32 %v1794_v4 }
 0x5d2   : > { %v2620_v21 = vpop.eup %2619  ;;  %1854 = vst.msk [vmem:[%s3221_s20 + $0x48] sm:$0xff] %vm1844_vm7, %v1837_v33  ;;  %v1836_v25 = vsel %vm1779_vm1, %v1738_v42, %v1813_v8 }
 0x5d3   : > { %v2622_v26 = vpop.eup %2621  ;;  %1853 = vst.msk [vmem:[%s3221_s20 + $0x40] sm:$0xff] %vm1844_vm7, %v1836_v25  ;;  %v1819_v14 = vmul.f32 0.6931472, %v2620_v21 }
 0x5d4   : > { %v1817_v56 = vmul.f32 0.6931472, %v2622_v26 }
 0x5d5   : > { %v1839_v50 = vsel %vm1779_vm1, %v2434_v49, %v1819_v14 }
 0x5d6   : > { %v2624_v15 = vpop.eup %2623  ;;  %1856 = vst.msk [vmem:[%s3221_s20 + $0x58] sm:$0xff] %vm1844_vm7, %v1839_v50  ;;  %v1838_v16 = vsel %vm1779_vm1, %v1748_v62, %v1817_v56 }
 0x5d7   : > { %v2626_v12 = vpop.eup %2625  ;;  %1855 = vst.msk [vmem:[%s3221_s20 + $0x50] sm:$0xff] %vm1844_vm7, %v1838_v16  ;;  %v1823_v27 = vmul.f32 0.6931472, %v2624_v15 }
 0x5d8   : > { %v1821_v19 = vmul.f32 0.6931472, %v2626_v12 }
 0x5d9   : > { %v1841_v17 = vsel %vm1779_vm1, %v2437_v11, %v1823_v27 }
 0x5da   : > { %v2628_v22 = vpop.eup %2627  ;;  %1858 = vst.msk [vmem:[%s3221_s20 + $0x68] sm:$0xff] %vm1844_vm7, %v1841_v17  ;;  %v1840_v23 = vsel %vm1779_vm1, %v1758_v34, %v1821_v19 }
 0x5db   : > { %v2630_v24 = vpop.eup %2629  ;;  %1857 = vst.msk [vmem:[%s3221_s20 + $0x60] sm:$0xff] %vm1844_vm7, %v1840_v23  ;;  %v1827_v20 = vmul.f32 0.6931472, %v2628_v22 }
 0x5dc   : > { %v1825_v40 = vmul.f32 0.6931472, %v2630_v24 }
 0x5dd   : > { %v1843_v29 = vsel %vm1779_vm1, %v2440_v45, %v1827_v20 }
 0x5de   : > { %1860 = vst.msk [vmem:[%s3221_s20 + $0x78] sm:$0xff] %vm1844_vm7, %v1843_v29  ;;  %v1842_v30 = vsel %vm1779_vm1, %v1768_v10, %v1825_v40 }
 0x5df   : > { %1859 = vst.msk [vmem:[%s3221_s20 + $0x70] sm:$0xff] %vm1844_vm7, %v1842_v30 }
 0x5e0 PF: > { %s16_s21 = sadd.s32 1, %s2637_s21  }
 0x5e1   : > { %p13_p4 = scmp.ge.s32.totalorder %s16_s21, 4  }
 0x5e3   :  { %15 = sbr.rel (!%p13_p4) target bundleno = 1 (0x1), region = 74 }

</bundles_post_ra>
